<compile_context>
chip_gen: v6e
topology: v6e:2x2x1
jax: 0.10.0
libtpu: 0.0.40
codegen_flags: <defaults>
</compile_context>

<pallas_src>
import functools

import jax
import jax.numpy as jnp
import numpy as np
from jax.experimental import pallas as pl
from jax.experimental.pallas import tpu as pltpu


def _horde_kernel(x_ref, wc_ref, we_ref, o_ref, acc_ref, *,
                  order, hod, hw, thw, tb, acc_lanes, mask_hw):
    """One (batch-tile, hw-tile) grid step.

    x_ref  : (TB, D, THW)                activation tile, channels-first, compute dtype
    wc_ref : (order*HOD, D)              fused 1x1-conv weights, compute dtype
    we_ref : (order-1, HOD, D)           linear weights, pre-transposed, f32
    o_ref  : (1, TB, (order-1)*D)        embeddings for this batch tile (lane-dense)
    acc_ref: (order-1, TB, HOD, LANES)   lane-wide partial spatial sums, f32
    """
    h = pl.program_id(1)
    nh = pl.num_programs(1)

    @pl.when(h == 0)
    def _init():
        acc_ref[...] = jnp.zeros(acc_ref.shape, acc_ref.dtype)

    wc = wc_ref[...]                                     # (order*HOD, D)

    if mask_hw:  # static flag: emitted only when HW % THW != 0 (ragged last tile)
        col = jax.lax.broadcasted_iota(jnp.int32, (1, thw), 1)
        valid = (h * thw + col) < hw                     # (1, THW)

    for b in range(tb):                                  # static unroll, tb <= 8
        x_b = x_ref[b]                                   # (D, THW)
        if mask_hw:
            x_b = jnp.where(valid, x_b, jnp.zeros_like(x_b))
        # One fused MXU matmul for all `order` 1x1 convolutions of this tile;
        # bf16 operands, f32 accumulation.
        proj = jnp.dot(wc, x_b, preferred_element_type=jnp.float32)  # (order*HOD, THW) f32
        cum = proj[0 * hod:1 * hod, :] * proj[1 * hod:2 * hod, :]
        for i in range(order - 1):                       # static; order is small
            if i > 0:
                cum = cum * proj[(i + 1) * hod:(i + 2) * hod, :]
            if acc_lanes == thw:
                # Single-tile / 128-wide-tile case: accumulate the raw lanes.
                acc_ref[i, b] += cum
            else:
                # VPU-only lane-block folding (128-aligned slices are free views);
                # the cross-lane XLU reduce is deferred to the finalize step.
                part = cum[:, 0:128]
                for j in range(1, thw // 128):
                    part = part + cum[:, j * 128:(j + 1) * 128]
                acc_ref[i, b] += part

    @pl.when(h == nh - 1)
    def _finalize():
        inv_hw = jnp.float32(1.0 / hw)                   # avg_pool2d over full H*W
        outs = []
        for i in range(order - 1):
            pooled = jnp.sum(acc_ref[i], axis=-1)        # (TB, HOD): one XLU reduce
            outs.append(jnp.dot(pooled, we_ref[i],
                                preferred_element_type=jnp.float32))  # (TB, D)
        out = jnp.concatenate(outs, axis=-1) * inv_hw    # (TB, (order-1)*D), lane-dense
        o_ref[0] = out.astype(o_ref.dtype)


def _vmem_bytes(tb, thw, acc_lanes, D, order, hod, x_bytes):
    """Conservative VMEM estimate: double-buffered inputs/outputs, ~2 live `proj`
    temporaries across the unrolled batch loop (perf-review item), + cum slack."""
    fixed = (2 * order * hod * D * x_bytes               # fused conv weights (x2 bufs)
             + 2 * (order - 1) * hod * D * 4             # linear weights     (x2 bufs)
             + 2 * tb * (order - 1) * D * 4              # output block       (x2 bufs)
             + (order - 1) * tb * hod * acc_lanes * 4)   # accumulator scratch
    per_hw = 2 * tb * D * x_bytes + 2 * order * hod * 4 + 2 * hod * 4
    return fixed + thw * per_hw


def _vmem_plan():
    """(tile-picking budget, vmem_limit_bytes), derived from the chip generation."""
    cap = 64 * 1024 * 1024                 # conservative fallback == v7x per-TC VMEM
    try:
        info = pltpu.get_tpu_info()
        cap = int(getattr(info, "vmem_capacity_bytes", cap) or cap)
    except Exception:
        pass
    limit = min(cap * 3 // 4, 112 * 1024 * 1024)   # ~48 MiB on v7x, ~96 MiB on v5e/v6e
    return (limit * 7) // 8, int(limit)


def _pick_tiles(B, D, HW, order, hod, budget, x_bytes):
    # Batch tile: several images per step amortize the ~0.35us/step overhead, but
    # keep >= 2 batch blocks so the "parallel" axis can shard across v7x's 2 TCs.
    tb = min(B, 8)
    if B >= 2:
        tb = min(tb, pl.cdiv(B, 2))
    # Option 1: single hw tile (accumulator lanes == HW; never needs a ragged mask).
    if HW < 128 or _vmem_bytes(tb, HW, HW, D, order, hod, x_bytes) <= budget:
        return tb, HW, HW
    # Option 2: 128-aligned hw tiles + a fixed 128-lane deferred-reduce accumulator.
    max_thw = min((HW // 128) * 128, 2048)   # returns flatten beyond ~1-2K lanes
    thw = 128
    for cand in range(128, max_thw + 1, 128):
        if _vmem_bytes(tb, cand, 128, D, order, hod, x_bytes) <= budget:
            thw = cand
    if HW % thw != 0:
        # Prefer a tile that divides HW exactly so the hot loop stays mask-free.
        for cand in range(thw, 127, -128):
            if HW % cand == 0:
                if 2 * cand >= thw:
                    thw = cand
                break
    return tb, thw, 128


def horde_cascaded_k_order(x_nchw, conv_weights, embed_weights, *,
                           compute_dtype=jnp.bfloat16, hw_tile=None):
    """x_nchw       : (B, D, H, W) activations (PyTorch NCHW layout).
    conv_weights : list of `order` arrays, each (HOD, D)    (1x1 conv weight squeezed)
    embed_weights: list of `order-1` arrays, each (D, HOD)  (nn.Linear weight)
    Returns (B, order-1, D) float32; out[:, i, :] equals the i-th tensor returned
    by the PyTorch forward."""
    order = len(conv_weights)
    # TODO(synk): order == 1 makes the PyTorch module return []; not lowered here.
    assert order >= 2 and len(embed_weights) == order - 1
    B, D, H, W = x_nchw.shape
    HW = H * W
    HOD = conv_weights[0].shape[0]

    # Channels-first (B, D, HW) is a FREE reshape of NCHW; the heavy activation
    # stream and the conv weights feed the MXU in the compute dtype (bf16 default).
    x = x_nchw.reshape(B, D, HW)
    if x.dtype != jnp.dtype(compute_dtype):
        x = x.astype(compute_dtype)
    wc = jnp.concatenate(conv_weights, axis=0).astype(compute_dtype)       # (order*HOD, D)
    # Pre-transpose the tiny linear weights (KBs) so the finalize matmul and the
    # output block are lane-dense and no wrapper transpose of the result is needed.
    we = jnp.stack([w.T for w in embed_weights], axis=0).astype(jnp.float32)  # (order-1, HOD, D)

    x_bytes = jnp.dtype(compute_dtype).itemsize
    budget, vmem_limit = _vmem_plan()
    tb, thw, acc_lanes = _pick_tiles(B, D, HW, order, HOD, budget, x_bytes)
    if hw_tile is not None:                                # test / tuning override
        thw = min(int(hw_tile), HW)
        acc_lanes = HW if thw == HW else 128
    assert thw == HW or thw % 128 == 0, "hw tile must be 128-aligned or the full extent"
    est = _vmem_bytes(tb, thw, acc_lanes, D, order, HOD, x_bytes)
    assert est <= vmem_limit, (
        f"tile choice (tb={tb}, thw={thw}) needs ~{est}B of VMEM; limit is {vmem_limit}B")

    nb = pl.cdiv(B, tb)
    nh = pl.cdiv(HW, thw)
    mask_hw = (HW % thw) != 0     # ragged last hw tile (tiled path only)

    kernel = functools.partial(_horde_kernel, order=order, hod=HOD, hw=HW, thw=thw,
                               tb=tb, acc_lanes=acc_lanes, mask_hw=mask_hw)

    flops = (2 * B * HW * D * order * HOD          # fused 1x1-conv matmuls
             + B * (order - 1) * HW * HOD          # cascaded elementwise products
             + 2 * B * (order - 1) * HOD * D)      # final linears
    bytes_accessed = int(x.size * x_bytes + wc.size * x_bytes + we.size * 4
                         + nb * tb * (order - 1) * D * 4)

    out3 = pl.pallas_call(
        kernel,
        out_shape=jax.ShapeDtypeStruct((nb, tb, (order - 1) * D), jnp.float32),
        grid_spec=pltpu.PrefetchScalarGridSpec(
            num_scalar_prefetch=0,
            grid=(nb, nh),                                 # reduction (hw) axis last
            in_specs=[
                pl.BlockSpec((tb, D, thw), lambda b, h: (b, 0, h)),
                # Constant-index weight blocks (fetched once).  For production-sized
                # HOD*D, pipeline_mode=pl.Buffered(1) would halve their VMEM.
                pl.BlockSpec((order * HOD, D), lambda b, h: (0, 0)),
                pl.BlockSpec((order - 1, HOD, D), lambda b, h: (0, 0, 0)),
            ],
            out_specs=pl.BlockSpec((1, tb, (order - 1) * D), lambda b, h: (b, 0, 0)),
            scratch_shapes=[pltpu.VMEM((order - 1, tb, HOD, acc_lanes), jnp.float32)],
        ),
        compiler_params=pltpu.CompilerParams(
            dimension_semantics=("parallel", "arbitrary"),
            vmem_limit_bytes=int(vmem_limit),
        ),
        cost_estimate=pl.CostEstimate(flops=int(flops), transcendentals=0,
                                      bytes_accessed=bytes_accessed),
    )(x, wc, we)

    # (nb, tb, (order-1)*D) -> (B, order-1, D); padded batch rows (if any) dropped.
    return out3.reshape(nb * tb, order - 1, D)[:B]


def _reference(x_nchw, conv_weights, embed_weights, compute_dtype=None):
    """Pure-JAX reference mirroring the PyTorch forward.  If `compute_dtype` is
    given, x / conv weights are rounded to it first (matching the kernel's MXU
    operand dtype) while all accumulation stays f32."""
    B, D, H, W = x_nchw.shape
    hp = jax.lax.Precision.HIGHEST
    xf = jnp.transpose(x_nchw, (0, 2, 3, 1)).reshape(B, H * W, D).astype(jnp.float32)
    cws = [w.astype(jnp.float32) for w in conv_weights]
    if compute_dtype is not None and jnp.dtype(compute_dtype) != jnp.dtype(jnp.float32):
        xf = xf.astype(compute_dtype).astype(jnp.float32)
        cws = [w.astype(compute_dtype).astype(jnp.float32) for w in cws]
    projs = [jnp.einsum("bpd,od->bpo", xf, w, precision=hp) for w in cws]
    projected = [projs[0] * projs[1]]
    for p in projs[2:]:
        projected.append(projected[-1] * p)
    outs = []
    for i, pr in enumerate(projected):
        pooled = jnp.mean(pr, axis=1)                    # (B, HOD)
        outs.append(jnp.einsum("bo,do->bd", pooled,
                               embed_weights[i].astype(jnp.float32), precision=hp))
    return jnp.stack(outs, axis=1)                       # (B, order-1, D)


if __name__ == "__main__":
    def _run_case(B, DIM, H, W, ORDER, HOD, hw_tile=None):
        key = jax.random.PRNGKey(0)
        kx, *kws = jax.random.split(key, 1 + ORDER + (ORDER - 1))
        x = jax.random.normal(kx, (B, DIM, H, W), dtype=jnp.float32)
        # Conv2d(dim->HOD, 1x1, bias=False) weight (HOD, DIM, 1, 1) squeezed -> (HOD, DIM)
        conv_weights = [0.2 * jax.random.normal(kws[i], (HOD, DIM), dtype=jnp.float32)
                        for i in range(ORDER)]
        # Linear(HOD->dim, bias=False) weight -> (DIM, HOD)
        embed_weights = [0.2 * jax.random.normal(kws[ORDER + i], (DIM, HOD), dtype=jnp.float32)
                         for i in range(ORDER - 1)]
        out = jax.block_until_ready(
            horde_cascaded_k_order(x, conv_weights, embed_weights, hw_tile=hw_tile))
        ref = jax.block_until_ready(
            _reference(x, conv_weights, embed_weights, compute_dtype=jnp.bfloat16))
        # Kernel uses bf16 MXU operands with f32 accumulation; reference applies the
        # same bf16 rounding, so the loose band only covers accumulation-order /
        # MXU-pass precision differences (structural bugs are O(1) relative).
        np.testing.assert_allclose(np.asarray(out), np.asarray(ref),
                                   rtol=2e-2, atol=1e-3)

    # Case 1: HW < 128 -> auto single-hw-tile path; 2 batch blocks (v7x megacore split).
    _run_case(B=4, DIM=32, H=8, W=8, ORDER=3, HOD=64)
    # Case 2: tiled hw axis (HW=512, tile=256): deferred 128-lane accumulator folding
    # two lane-blocks per step; padded last batch block (B=3, tb=2).
    _run_case(B=3, DIM=32, H=16, W=32, ORDER=4, HOD=64, hw_tile=256)
    # Case 3: ragged spatial extent (HW=200, tile=128): masked last hw tile.
    _run_case(B=2, DIM=32, H=10, W=20, ORDER=4, HOD=64, hw_tile=128)

    print("KERNEL_OK")
</pallas_src>

<mosaic_0001>
module attributes {stable_mosaic.version = 11 : i64} {
  func.func @_horde_kernel(%arg0: i32, %arg1: i32, %arg2: memref<2x32x64xbf16, #tpu.memory_space<vmem>>, %arg3: memref<192x32xbf16, #tpu.memory_space<vmem>>, %arg4: memref<2x64x32xf32, #tpu.memory_space<vmem>>, %arg5: memref<1x2x64xf32, #tpu.memory_space<vmem>>, %arg6: memref<2x2x64x64xf32, #tpu.memory_space<vmem>>) attributes {dimension_semantics = [#tpu.dimension_semantics<parallel>, #tpu.dimension_semantics<arbitrary>], iteration_bounds = array<i64: 2, 1>, scalar_prefetch = 0 : i64, scratch_operands = 1 : i64, tpu.core_type = #tpu.core_type<tc>, window_params = [{transform_indices = @transform_0, window_bounds = array<i64: 2, 32, 64>}, {pipeline_mode = #tpu.pipeline_mode<synchronous>, transform_indices = @transform_1, window_bounds = array<i64: 192, 32>}, {pipeline_mode = #tpu.pipeline_mode<synchronous>, transform_indices = @transform_2, window_bounds = array<i64: 2, 64, 32>}, {transform_indices = @transform_3, window_bounds = array<i64: 1, 2, 64>}]} {
    %c0_i32 = arith.constant 0 : i32
    %0 = arith.cmpi eq, %arg1, %c0_i32 : i32
    %1 = arith.extui %0 : i1 to i32
    %c0_i32_0 = arith.constant 0 : i32
    %2 = arith.cmpi ne, %1, %c0_i32_0 : i32
    scf.if %2 {
      %cst_42 = arith.constant 0.000000e+00 : f32
      %47 = vector.broadcast %cst_42 : f32 to vector<2x2x64x64xf32>
      %c0_43 = arith.constant 0 : index
      %c0_44 = arith.constant 0 : index
      %c0_45 = arith.constant 0 : index
      %c0_46 = arith.constant 0 : index
      %48 = vector.load %arg6[%c0_43, %c0_44, %c0_45, %c0_46] : memref<2x2x64x64xf32, #tpu.memory_space<vmem>>, vector<2x2x64x64xf32>
      tpu.vector_store %arg6[%c0_43, %c0_44, %c0_45, %c0_46], %47 {strides = array<i32>} : memref<2x2x64x64xf32, #tpu.memory_space<vmem>>, vector<2x2x64x64xf32>,
    } else {
    }
    %c0 = arith.constant 0 : index
    %c0_1 = arith.constant 0 : index
    %3 = vector.load %arg3[%c0, %c0_1] : memref<192x32xbf16, #tpu.memory_space<vmem>>, vector<192x32xbf16>
    %c0_2 = arith.constant 0 : index
    %c0_3 = arith.constant 0 : index
    %c0_4 = arith.constant 0 : index
    %4 = vector.load %arg2[%c0_2, %c0_3, %c0_4] : memref<2x32x64xbf16, #tpu.memory_space<vmem>>, vector<1x32x64xbf16>
    %5 = vector.shape_cast %4 : vector<1x32x64xbf16> to vector<32x64xbf16>
    %cst = arith.constant dense<0.000000e+00> : vector<192x64xf32>
    %6 = tpu.matmul %3, %5, %cst {dimension_numbers = #tpu.dot_dimension_numbers<[1], [0], [0], [1], [0, 0, 1, 1], [], []>} : vector<192x32xbf16>, vector<32x64xbf16>, vector<192x64xf32> -> vector<192x64xf32>
    %7 = vector.extract_strided_slice %6 {offsets = [0, 0], sizes = [64, 64], strides = [1, 1]} : vector<192x64xf32> to vector<64x64xf32>
    %8 = vector.extract_strided_slice %6 {offsets = [64, 0], sizes = [64, 64], strides = [1, 1]} : vector<192x64xf32> to vector<64x64xf32>
    %9 = arith.mulf %7, %8 : vector<64x64xf32>
    %c0_5 = arith.constant 0 : index
    %c0_6 = arith.constant 0 : index
    %c0_7 = arith.constant 0 : index
    %c0_8 = arith.constant 0 : index
    %10 = vector.load %arg6[%c0_5, %c0_6, %c0_7, %c0_8] : memref<2x2x64x64xf32, #tpu.memory_space<vmem>>, vector<1x1x64x64xf32>
    %11 = vector.shape_cast %10 : vector<1x1x64x64xf32> to vector<64x64xf32>
    %12 = arith.addf %11, %9 : vector<64x64xf32>
    %c0_9 = arith.constant 0 : index
    %c0_10 = arith.constant 0 : index
    %c0_11 = arith.constant 0 : index
    %c0_12 = arith.constant 0 : index
    %13 = vector.load %arg6[%c0_9, %c0_10, %c0_11, %c0_12] : memref<2x2x64x64xf32, #tpu.memory_space<vmem>>, vector<1x1x64x64xf32>
    %14 = vector.shape_cast %13 : vector<1x1x64x64xf32> to vector<64x64xf32>
    %15 = vector.shape_cast %12 : vector<64x64xf32> to vector<1x1x64x64xf32>
    tpu.vector_store %arg6[%c0_9, %c0_10, %c0_11, %c0_12], %15 {strides = array<i32>} : memref<2x2x64x64xf32, #tpu.memory_space<vmem>>, vector<1x1x64x64xf32>,
    %16 = vector.extract_strided_slice %6 {offsets = [128, 0], sizes = [64, 64], strides = [1, 1]} : vector<192x64xf32> to vector<64x64xf32>
    %17 = arith.mulf %9, %16 : vector<64x64xf32>
    %c1 = arith.constant 1 : index
    %c0_13 = arith.constant 0 : index
    %c0_14 = arith.constant 0 : index
    %c0_15 = arith.constant 0 : index
    %18 = vector.load %arg6[%c1, %c0_13, %c0_14, %c0_15] : memref<2x2x64x64xf32, #tpu.memory_space<vmem>>, vector<1x1x64x64xf32>
    %19 = vector.shape_cast %18 : vector<1x1x64x64xf32> to vector<64x64xf32>
    %20 = arith.addf %19, %17 : vector<64x64xf32>
    %c1_16 = arith.constant 1 : index
    %c0_17 = arith.constant 0 : index
    %c0_18 = arith.constant 0 : index
    %c0_19 = arith.constant 0 : index
    %21 = vector.load %arg6[%c1_16, %c0_17, %c0_18, %c0_19] : memref<2x2x64x64xf32, #tpu.memory_space<vmem>>, vector<1x1x64x64xf32>
    %22 = vector.shape_cast %21 : vector<1x1x64x64xf32> to vector<64x64xf32>
    %23 = vector.shape_cast %20 : vector<64x64xf32> to vector<1x1x64x64xf32>
    tpu.vector_store %arg6[%c1_16, %c0_17, %c0_18, %c0_19], %23 {strides = array<i32>} : memref<2x2x64x64xf32, #tpu.memory_space<vmem>>, vector<1x1x64x64xf32>,
    %c1_20 = arith.constant 1 : index
    %c0_21 = arith.constant 0 : index
    %c0_22 = arith.constant 0 : index
    %24 = vector.load %arg2[%c1_20, %c0_21, %c0_22] : memref<2x32x64xbf16, #tpu.memory_space<vmem>>, vector<1x32x64xbf16>
    %25 = vector.shape_cast %24 : vector<1x32x64xbf16> to vector<32x64xbf16>
    %cst_23 = arith.constant dense<0.000000e+00> : vector<192x64xf32>
    %26 = tpu.matmul %3, %25, %cst_23 {dimension_numbers = #tpu.dot_dimension_numbers<[1], [0], [0], [1], [0, 0, 1, 1], [], []>} : vector<192x32xbf16>, vector<32x64xbf16>, vector<192x64xf32> -> vector<192x64xf32>
    %27 = vector.extract_strided_slice %26 {offsets = [0, 0], sizes = [64, 64], strides = [1, 1]} : vector<192x64xf32> to vector<64x64xf32>
    %28 = vector.extract_strided_slice %26 {offsets = [64, 0], sizes = [64, 64], strides = [1, 1]} : vector<192x64xf32> to vector<64x64xf32>
    %29 = arith.mulf %27, %28 : vector<64x64xf32>
    %c0_24 = arith.constant 0 : index
    %c1_25 = arith.constant 1 : index
    %c0_26 = arith.constant 0 : index
    %c0_27 = arith.constant 0 : index
    %30 = vector.load %arg6[%c0_24, %c1_25, %c0_26, %c0_27] : memref<2x2x64x64xf32, #tpu.memory_space<vmem>>, vector<1x1x64x64xf32>
    %31 = vector.shape_cast %30 : vector<1x1x64x64xf32> to vector<64x64xf32>
    %32 = arith.addf %31, %29 : vector<64x64xf32>
    %c0_28 = arith.constant 0 : index
    %c1_29 = arith.constant 1 : index
    %c0_30 = arith.constant 0 : index
    %c0_31 = arith.constant 0 : index
    %33 = vector.load %arg6[%c0_28, %c1_29, %c0_30, %c0_31] : memref<2x2x64x64xf32, #tpu.memory_space<vmem>>, vector<1x1x64x64xf32>
    %34 = vector.shape_cast %33 : vector<1x1x64x64xf32> to vector<64x64xf32>
    %35 = vector.shape_cast %32 : vector<64x64xf32> to vector<1x1x64x64xf32>
    tpu.vector_store %arg6[%c0_28, %c1_29, %c0_30, %c0_31], %35 {strides = array<i32>} : memref<2x2x64x64xf32, #tpu.memory_space<vmem>>, vector<1x1x64x64xf32>,
    %36 = vector.extract_strided_slice %26 {offsets = [128, 0], sizes = [64, 64], strides = [1, 1]} : vector<192x64xf32> to vector<64x64xf32>
    %37 = arith.mulf %29, %36 : vector<64x64xf32>
    %c1_32 = arith.constant 1 : index
    %c1_33 = arith.constant 1 : index
    %c0_34 = arith.constant 0 : index
    %c0_35 = arith.constant 0 : index
    %38 = vector.load %arg6[%c1_32, %c1_33, %c0_34, %c0_35] : memref<2x2x64x64xf32, #tpu.memory_space<vmem>>, vector<1x1x64x64xf32>
    %39 = vector.shape_cast %38 : vector<1x1x64x64xf32> to vector<64x64xf32>
    %40 = arith.addf %39, %37 : vector<64x64xf32>
    %c1_36 = arith.constant 1 : index
    %c1_37 = arith.constant 1 : index
    %c0_38 = arith.constant 0 : index
    %c0_39 = arith.constant 0 : index
    %41 = vector.load %arg6[%c1_36, %c1_37, %c0_38, %c0_39] : memref<2x2x64x64xf32, #tpu.memory_space<vmem>>, vector<1x1x64x64xf32>
    %42 = vector.shape_cast %41 : vector<1x1x64x64xf32> to vector<64x64xf32>
    %43 = vector.shape_cast %40 : vector<64x64xf32> to vector<1x1x64x64xf32>
    tpu.vector_store %arg6[%c1_36, %c1_37, %c0_38, %c0_39], %43 {strides = array<i32>} : memref<2x2x64x64xf32, #tpu.memory_space<vmem>>, vector<1x1x64x64xf32>,
    %c0_i32_40 = arith.constant 0 : i32
    %44 = arith.cmpi eq, %arg1, %c0_i32_40 : i32
    %45 = arith.extui %44 : i1 to i32
    %c0_i32_41 = arith.constant 0 : i32
    %46 = arith.cmpi ne, %45, %c0_i32_41 : i32
    scf.if %46 {
      %c0_42 = arith.constant 0 : index
      %c0_43 = arith.constant 0 : index
      %c0_44 = arith.constant 0 : index
      %c0_45 = arith.constant 0 : index
      %47 = vector.load %arg6[%c0_42, %c0_43, %c0_44, %c0_45] : memref<2x2x64x64xf32, #tpu.memory_space<vmem>>, vector<1x2x64x64xf32>
      %48 = vector.shape_cast %47 : vector<1x2x64x64xf32> to vector<2x64x64xf32>
      %cst_46 = arith.constant dense<0.000000e+00> : vector<2x64xf32>
      %49 = vector.multi_reduction <add>, %48, %cst_46 [2] : vector<2x64x64xf32> to vector<2x64xf32>
      %c0_47 = arith.constant 0 : index
      %c0_48 = arith.constant 0 : index
      %c0_49 = arith.constant 0 : index
      %50 = vector.load %arg4[%c0_47, %c0_48, %c0_49] : memref<2x64x32xf32, #tpu.memory_space<vmem>>, vector<1x64x32xf32>
      %51 = vector.shape_cast %50 : vector<1x64x32xf32> to vector<64x32xf32>
      %cst_50 = arith.constant dense<0.000000e+00> : vector<2x32xf32>
      %52 = tpu.matmul %49, %51, %cst_50 {dimension_numbers = #tpu.dot_dimension_numbers<[1], [0], [0], [1], [0, 0, 1, 1], [], []>} : vector<2x64xf32>, vector<64x32xf32>, vector<2x32xf32> -> vector<2x32xf32>
      %c1_51 = arith.constant 1 : index
      %c0_52 = arith.constant 0 : index
      %c0_53 = arith.constant 0 : index
      %c0_54 = arith.constant 0 : index
      %53 = vector.load %arg6[%c1_51, %c0_52, %c0_53, %c0_54] : memref<2x2x64x64xf32, #tpu.memory_space<vmem>>, vector<1x2x64x64xf32>
      %54 = vector.shape_cast %53 : vector<1x2x64x64xf32> to vector<2x64x64xf32>
      %cst_55 = arith.constant dense<0.000000e+00> : vector<2x64xf32>
      %55 = vector.multi_reduction <add>, %54, %cst_55 [2] : vector<2x64x64xf32> to vector<2x64xf32>
      %c1_56 = arith.constant 1 : index
      %c0_57 = arith.constant 0 : index
      %c0_58 = arith.constant 0 : index
      %56 = vector.load %arg4[%c1_56, %c0_57, %c0_58] : memref<2x64x32xf32, #tpu.memory_space<vmem>>, vector<1x64x32xf32>
      %57 = vector.shape_cast %56 : vector<1x64x32xf32> to vector<64x32xf32>
      %cst_59 = arith.constant dense<0.000000e+00> : vector<2x32xf32>
      %58 = tpu.matmul %55, %57, %cst_59 {dimension_numbers = #tpu.dot_dimension_numbers<[1], [0], [0], [1], [0, 0, 1, 1], [], []>} : vector<2x64xf32>, vector<64x32xf32>, vector<2x32xf32> -> vector<2x32xf32>
      %59 = tpu.concatenate %52, %58 in 1 : vector<2x32xf32>, vector<2x32xf32> -> vector<2x64xf32>
      %cst_60 = arith.constant 1.562500e-02 : f32
      %60 = vector.broadcast %cst_60 : f32 to vector<2x64xf32>
      %61 = arith.mulf %59, %60 : vector<2x64xf32>
      %c0_61 = arith.constant 0 : index
      %c0_62 = arith.constant 0 : index
      %c0_63 = arith.constant 0 : index
      %62 = vector.load %arg5[%c0_61, %c0_62, %c0_63] : memref<1x2x64xf32, #tpu.memory_space<vmem>>, vector<1x2x64xf32>
      %63 = vector.shape_cast %62 : vector<1x2x64xf32> to vector<2x64xf32>
      %64 = vector.shape_cast %61 : vector<2x64xf32> to vector<1x2x64xf32>
      tpu.vector_store %arg5[%c0_61, %c0_62, %c0_63], %64 {strides = array<i32>} : memref<1x2x64xf32, #tpu.memory_space<vmem>>, vector<1x2x64xf32>,
    } else {
    }
    return
  }
  func.func @transform_0(%arg0: i32, %arg1: i32) -> (i32, i32, i32) {
    %c0_i32 = arith.constant 0 : i32
    %c0_i32_0 = arith.constant 0 : i32
    return %arg0, %c0_i32, %arg1 : i32, i32, i32
  }
  func.func @transform_1(%arg0: i32, %arg1: i32) -> (i32, i32) {
    %c0_i32 = arith.constant 0 : i32
    %c0_i32_0 = arith.constant 0 : i32
    %c0_i32_1 = arith.constant 0 : i32
    return %c0_i32, %c0_i32_0 : i32, i32
  }
  func.func @transform_2(%arg0: i32, %arg1: i32) -> (i32, i32, i32) {
    %c0_i32 = arith.constant 0 : i32
    %c0_i32_0 = arith.constant 0 : i32
    %c0_i32_1 = arith.constant 0 : i32
    %c0_i32_2 = arith.constant 0 : i32
    return %c0_i32, %c0_i32_0, %c0_i32_1 : i32, i32, i32
  }
  func.func @transform_3(%arg0: i32, %arg1: i32) -> (i32, i32, i32) {
    %c0_i32 = arith.constant 0 : i32
    %c0_i32_0 = arith.constant 0 : i32
    %c0_i32_1 = arith.constant 0 : i32
    return %arg0, %c0_i32, %c0_i32_0 : i32, i32, i32
  }
}

</mosaic_0001>

<bundles_post_ra>
// kernel: tpu_custom_call.1
= control target key start
LH: loop header
LB: loop body
LE: loop exit
PB: predicated region body
PF: predicated region fallthrough
CT: control target
= control target key end

     0   :  { %8 = vsyncpa [#allocation4], 0  ;;  %s2263_s0 = inlined_call_operand.vmem [shape: bf16[4,32,64], index: 0, kind: input, shape index: {}]   ;;  %s2264_s1 = inlined_call_operand.vmem [shape: bf16[192,32], index: 1, kind: input, shape index: {}]   ;;  %s2265_s2 = inlined_call_operand.vmem [shape: f32[2,64,32], index: 2, kind: input, shape index: {}]   ;;  %s2266_s3 = inlined_call_operand.hbm [shape: f32[2,2,64], index: 3, kind: output, shape index: {}]  }
   0x1   :  { %10 = vsyncpa [#allocation4 + $0x1], 0  ;;  %s1757_s12 = smov 0   ;;  %s1759_s13 = smov 0  }
   0x2   :  { %s1761_s14 = smov 0   ;;  %s1763_s15 = smov 0  }
   0x3   :  { %s1765_s16 = smov 0   ;;  %s1767_s17 = smov 0  }
   0x4 LB: > { %s1373_s18 = sadd.s32 4294967295, %s1731_s17   ;;  %s1374_s19 = sadd.s32 4294967294, %s1731_s17   ;;  %s1731_s17 = sphi %s1767_s17, %s16_s17   ;;  %s1727_s16 = sphi %s1765_s16, %s2273_s16   ;;  %s1723_s15 = sphi %s1763_s15, %s2272_s15   ;;  %s1719_s14 = sphi %s1761_s14, %s2271_s14   ;;  %s1715_s13 = sphi %s1759_s13, %s2270_s13   ;;  %s1711_s12 = sphi %s1757_s12, %s2269_s12  }
   0x5   : > { %s28_s20 = sadd.s32 1, %s1727_s16  ;;  %s105_s21 = sadd.s32 1, %s1719_s14 }
   0x6   : > { %p30_p0 = scmp.ge.s32.totalorder %s28_s20, 2  ;;  %p115_p1 = scmp.ne.s32.totalorder %s1719_s14, %s1715_s13 }
   0x7   : > { %p116_p2 = scmp.eq.s32.totalorder %s1373_s18, 1  ;;  %p121_p3 = scmp.ne.s32.totalorder %s1715_s13, %s1711_s12 }
   0x8   : > { %s2275_s20 = smov (%p30_p0, %s28_s20), 0  ;;  %p122_p5 = scmp.eq.s32.totalorder %s1374_s19, 1 }
   0x9   : > { %p1797_p4 = por %p116_p2, %p115_p1  ;;  %s102_s23 = ssub.s32 %s1727_s16, %s2275_s20 }
   0xa   : > { %p1377_p6 = scmp.ge.s32.totalorder %s1731_s17, 1  ;;  %p103_p7 = scmp.eq.s32.totalorder %s102_s23, 0 }
   0xb   : > { %p1804_p8 = por %p122_p5, %p121_p3  ;;  %p159_p9 = scmp.lt.s32.totalorder %s1731_s17, 3 }
   0xc   : > { %s1810_s25 = scalar_select %p103_p7, %s1719_s14, %s105_s21  }
   0xd   : > { %p160_p10 = pnand %p1377_p6, %p159_p9 }
   0xe   : > { %s1379_s26 = sshll.u32 (!%p160_p10), %s1723_s15, 1  ;;  %s1735_s9 = smov (!%p160_p10), 32  }
   0xf   : > { %163 = sbr.rel (%p160_p10) target bundleno = 765 (0x2fd), region = 32  ;;  %p188_p11 = scmp.lt.s32.totalorder (!%p160_p10), %s1379_s26, 3 }
  0x10   : > { %s184_s10 = sand.u32 (!%p160_p10), 1, %s1715_s13   ;;  %s1437_s18 = sshll.u32 (!%p160_p10), %s1723_s15, 5 }
  0x11   : > { %s1378_s11 = sshll.u32 (!%p160_p10), %s184_s10, 1  ;;  %s1298_s27 = scalar_lea.hbm (!%p160_p10), %s2266_s3, %s1437_s18 }
  0x12   : > { %s186_s19 = scalar_lea.vmem (!%p160_p10), [#allocation3], %s1378_s11  ;;  %s1287_s28 = scalar_lea.sflag (!%p160_p10), [#allocation4], %s184_s10 }
  0x13   : > { %s1300_s21 = sshll.u32 (!%p160_p10), %s186_s19, 4  ;;  %s1736_s15 = smov (!%p160_p10), [#allocation3]   ;;  %s1301_s21 = int_to_ptr.vmem [resolvable:$true] %s1300_s21 }
  0x14   : > { %v1643_v0 = vld [vmem:[%s2264_s1] sm:$0xff]   ;;  %vm335_vm0 = vcmask 261120   ;;  %s2277_s26 = smov (!%p188_p11, %s1379_s26), 3  ;;  %v1644_v5 = vld [vmem:[%s2264_s1 + $0x8] sm:$0xff]   ;;  %v1645_v6 = vld [vmem:[%s2264_s1 + $0x10] sm:$0xff]   ;;  %vm202_vm1 = vcmask 523264  }
  0x15   : > { %1491 = vmatprep.mubr.msk.bf16.mxu0 %vm335_vm0, %v1643_v0  ;;  %1519 = vmatprep.mubr.msk.bf16.mxu1 %vm335_vm0, %v1643_v0  ;;  %s1440_s29 = sshll.u32 %s2277_s26, 4  ;;  %v1646_v7 = vld [vmem:[%s2264_s1 + $0x18] sm:$0xff]   ;;  %v1647_v8 = vld [vmem:[%s2264_s1 + $0x20] sm:$0xff]   ;;  %v1648_v9 = vld [vmem:[%s2264_s1 + $0x28] sm:$0xff]   ;;  %v1733_v16 = vmov 0.0   ;;  %vm1734_vm2 = vmmov 0  }
  0x16   : > { %s195_s5 = scalar_lea.vmem %s2263_s0, %s1440_s29  ;;  %v1649_v10 = vld [vmem:[%s2264_s1 + $0x30] sm:$0xff]   ;;  %v1650_v11 = vld [vmem:[%s2264_s1 + $0x38] sm:$0xff]   ;;  %v1651_v12 = vld [vmem:[%s2264_s1 + $0x40] sm:$0xff]   ;;  %205 = vst.msk [vmem:[#allocation2 + $0x10] sm:$0xff] %vm202_vm1, %v1733_v16  ;;  %vm881_vm3 = vcmask 130112   ;;  %vm888_vm4 = vcmask 195712  }
  0x17   : > { %v1639_v1 = vld [vmem:[%s195_s5 + $0x8] sm:$0xff]   ;;  %v1640_v2 = vld [vmem:[%s195_s5 + $0x18] sm:$0xff]   ;;  %v1641_v3 = vld [vmem:[%s195_s5] sm:$0xff]   ;;  %203 = vst.msk [vmem:[#allocation2] sm:$0xff] %vm202_vm1, %v1733_v16  ;;  %vm895_vm5 = vcmask 261312   ;;  %vm902_vm6 = vcmask 326912  }
  0x18   : > { %1487 = vmatprep.subr.bf16.mxu0 %v1639_v1  ;;  %1515 = vmatprep.subr.bf16.mxu1 %v1640_v2  ;;  %v1642_v4 = vld [vmem:[%s195_s5 + $0x10] sm:$0xff]   ;;  %v1652_v13 = vld [vmem:[%s2264_s1 + $0x48] sm:$0xff]   ;;  %v1654_v15 = vld [vmem:[%s2264_s1 + $0x58] sm:$0xff]   ;;  %204 = vst.msk [vmem:[#allocation2 + $0x8] sm:$0xff] %vm202_vm1, %v1733_v16  ;;  %vm909_vm7 = vcmask 392512   ;;  %vm916_vm8 = vcmask 458112  }
  0x19   : > { %1488 = vmatpush3.bf16.msra.mxu0 %v1639_v1  ;;  %1516 = vmatpush3.bf16.msra.mxu1 %v1640_v2  ;;  %v1653_v14 = vld [vmem:[%s2264_s1 + $0x50] sm:$0xff]   ;;  %206 = vst.msk [vmem:[#allocation2 + $0x18] sm:$0xff] %vm202_vm1, %v1733_v16  ;;  %207 = vst.msk [vmem:[#allocation2 + $0x20] sm:$0xff] %vm202_vm1, %v1733_v16  ;;  %v1434_v17 = vld [vmem:[%s2265_s2 + $0x78] sm:$0xff]  ;;  %vm923_vm9 = vcmask 523712   ;;  %vm964_vm10 = vcmask 1041409  }
  0x1a   : > { %1489 = vmatprep.subr.bf16.mxu0 %v1641_v3  ;;  %1517 = vmatprep.subr.bf16.mxu1 %v1642_v4  ;;  %208 = vst.msk [vmem:[#allocation2 + $0x28] sm:$0xff] %vm202_vm1, %v1733_v16  ;;  %209 = vst.msk [vmem:[#allocation2 + $0x30] sm:$0xff] %vm202_vm1, %v1733_v16  ;;  %v1433_v18 = vld [vmem:[%s2265_s2 + $0x70] sm:$0xff]  ;;  %v1432_v19 = vld [vmem:[%s2265_s2 + $0x68] sm:$0xff]  ;;  %vm1284_vm11 = vcmask 517120   ;;  %s1655_s29 = scalar_lea.vmem %s1301_s21, 32 }
  0x1b   : > { %210 = vst.msk [vmem:[#allocation2 + $0x38] sm:$0xff] %vm202_vm1, %v1733_v16  ;;  %211 = vst.msk [vmem:[#allocation2 + $0x40] sm:$0xff] %vm202_vm1, %v1733_v16  ;;  %p1656_p12 = scmp.ne.s32.totalorder %s1301_s21, %s1655_s29  ;;  %s1659_s30 = sshll.u32 %s1736_s15, 4  ;;  %s1660_s30 = int_to_ptr.vmem [resolvable:$false] %s1659_s30 }
  0x1c   : > { %212 = vst.msk [vmem:[#allocation2 + $0x48] sm:$0xff] %vm202_vm1, %v1733_v16  ;;  %213 = vst.msk [vmem:[#allocation2 + $0x50] sm:$0xff] %vm202_vm1, %v1733_v16  ;;  %s1661_s4 = scalar_lea.vmem %s1660_s30, 64  ;;  %p1662_p1 = scmp.lt.s32.totalorder %s1301_s21, %s1660_s30 }
  0x1d   : > { %1490 = vmatpush3.bf16.msra.mxu0 %v1641_v3  ;;  %1518 = vmatpush3.bf16.msra.mxu1 %v1642_v4  ;;  %214 = vst.msk [vmem:[#allocation2 + $0x58] sm:$0xff] %vm202_vm1, %v1733_v16  ;;  %215 = vst.msk [vmem:[#allocation2 + $0x60] sm:$0xff] %vm202_vm1, %v1733_v16  ;;  %v511_v37 = vld [vmem:[#allocation2 + $0x10] sm:$0xff]  ;;  %p1657_p13 = pnand %p1656_p12, %p1797_p4  ;;  %p1663_p2 = scmp.lt.s32.totalorder %s1661_s4, %s1655_s29 }
  0x1e   : > { %216 = vst.msk [vmem:[#allocation2 + $0x68] sm:$0xff] %vm202_vm1, %v1733_v16  ;;  %217 = vst.msk [vmem:[#allocation2 + $0x70] sm:$0xff] %vm202_vm1, %v1733_v16  ;;  %1562 = vmatprep.subr.mxu1 %v1733_v16  ;;  %1543 = vmatprep.subr.mxu0 %v1733_v16  ;;  %v509_v43 = vld [vmem:[#allocation2] sm:$0xff] }
  0x1f   : > { %218 = vst.msk [vmem:[#allocation2 + $0x78] sm:$0xff] %vm202_vm1, %v1733_v16  ;;  %219 = vst.msk [vmem:[#allocation2 + $0x80] sm:$0xff] %vm202_vm1, %v1733_v16  ;;  %v510_v59 = vld [vmem:[#allocation2 + $0x8] sm:$0xff]  ;;  %p1658_p0 = pneg %p1657_p13  ;;  %p1664_p3 = por %p1663_p2, %p1662_p1 }
  0x20   : > { %1492 = vmatmul.mubr.msk.bf16.vlgmr.msra.gmra.mxu0 %vm335_vm0, %v1644_v5  ;;  %1520 = vmatmul.mubr.msk.bf16.vlgmr.msra.gmra.mxu1 %vm335_vm0, %v1644_v5  ;;  %220 = vst.msk [vmem:[#allocation2 + $0x88] sm:$0xff] %vm202_vm1, %v1733_v16  ;;  %221 = vst.msk [vmem:[#allocation2 + $0x90] sm:$0xff] %vm202_vm1, %v1733_v16  ;;  %v512_v51 = vld [vmem:[#allocation2 + $0x18] sm:$0xff] }
  0x21   : > { %1495 = vmatprep.mubr.msk.bf16.mxu0 %vm335_vm0, %v1645_v6  ;;  %1523 = vmatprep.mubr.msk.bf16.mxu1 %vm335_vm0, %v1645_v6  ;;  %222 = vst.msk [vmem:[#allocation2 + $0x98] sm:$0xff] %vm202_vm1, %v1733_v16  ;;  %223 = vst.msk [vmem:[#allocation2 + $0xa0] sm:$0xff] %vm202_vm1, %v1733_v16  ;;  %v515_v3 = vld [vmem:[#allocation2 + $0x30] sm:$0xff]  ;;  %p1665_p5 = pnand %p1664_p3, %p1658_p0 }
  0x22   : > { %224 = vst.msk [vmem:[#allocation2 + $0xa8] sm:$0xff] %vm202_vm1, %v1733_v16  ;;  %225 = vst.msk [vmem:[#allocation2 + $0xb0] sm:$0xff] %vm202_vm1, %v1733_v16  ;;  %1563 = vmatpush3.msra.mxu1 %v1434_v17  ;;  %v722_v47 = vld [vmem:[#allocation2 + $0x40] sm:$0xff] }
  0x23   : > { %226 = vst.msk [vmem:[#allocation2 + $0xb8] sm:$0xff] %vm202_vm1, %v1733_v16  ;;  %227 = vst.msk [vmem:[#allocation2 + $0xc0] sm:$0xff] %vm202_vm1, %v1733_v16  ;;  %1564 = vmatprep.subr.mxu1 %v1733_v16  ;;  %v724_v40 = vld [vmem:[#allocation2 + $0x50] sm:$0xff]  ;;  %v723_v63 = vld [vmem:[#allocation2 + $0x48] sm:$0xff] }
  0x24   : > { %228 = vst.msk [vmem:[#allocation2 + $0xc8] sm:$0xff] %vm202_vm1, %v1733_v16  ;;  %229 = vst.msk [vmem:[#allocation2 + $0xd0] sm:$0xff] %vm202_vm1, %v1733_v16  ;;  %1565 = vmatpush3.msra.mxu1 %v1433_v18  ;;  %v725_v55 = vld [vmem:[#allocation2 + $0x58] sm:$0xff] }
  0x25   : > { %230 = vst.msk [vmem:[#allocation2 + $0xd8] sm:$0xff] %vm202_vm1, %v1733_v16  ;;  %231 = vst.msk [vmem:[#allocation2 + $0xe0] sm:$0xff] %vm202_vm1, %v1733_v16  ;;  %1566 = vmatprep.subr.mxu1 %v1733_v16 }
  0x26   : > { %232 = vst.msk [vmem:[#allocation2 + $0xe8] sm:$0xff] %vm202_vm1, %v1733_v16  ;;  %233 = vst.msk [vmem:[#allocation2 + $0xf0] sm:$0xff] %vm202_vm1, %v1733_v16  ;;  %1567 = vmatpush3.msra.mxu1 %v1432_v19 }
  0x27   : > { %234 = vst.msk [vmem:[#allocation2 + $0xf8] sm:$0xff] %vm202_vm1, %v1733_v16  ;;  %1568 = vmatprep.subr.mxu1 %v1733_v16 }
  0x28   : > { %1496 = vmatmul.mubr.msk.bf16.gmra.mxu0 %vm335_vm0, %v1646_v7  ;;  %1524 = vmatmul.mubr.msk.bf16.gmra.mxu1 %vm335_vm0, %v1646_v7  ;;  %v728_v7 = vld [vmem:[#allocation2 + $0x70] sm:$0xff] }
  0x29   : > { %1499 = vmatprep.mubr.msk.bf16.mxu0 %vm335_vm0, %v1647_v8  ;;  %1527 = vmatprep.mubr.msk.bf16.mxu1 %vm335_vm0, %v1647_v8 }
  0x30   : > { %1500 = vmatmul.mubr.msk.bf16.gmra.mxu0 %vm335_vm0, %v1648_v9  ;;  %1528 = vmatmul.mubr.msk.bf16.gmra.mxu1 %vm335_vm0, %v1648_v9 }
  0x31   : > { %1503 = vmatprep.mubr.msk.bf16.mxu0 %vm335_vm0, %v1649_v10  ;;  %1531 = vmatprep.mubr.msk.bf16.mxu1 %vm335_vm0, %v1649_v10 }
  0x38   : > { %1504 = vmatmul.mubr.msk.bf16.gmra.mxu0 %vm335_vm0, %v1650_v11  ;;  %1532 = vmatmul.mubr.msk.bf16.gmra.mxu1 %vm335_vm0, %v1650_v11  ;;  %v513_v11 = vld [vmem:[#allocation2 + $0x20] sm:$0xff] }
  0x39   : > { %1507 = vmatprep.mubr.msk.bf16.mxu0 %vm335_vm0, %v1651_v12  ;;  %1535 = vmatprep.mubr.msk.bf16.mxu1 %vm335_vm0, %v1651_v12 }
  0x40   : > { %1508 = vmatmul.mubr.msk.bf16.gmra.mxu0 %vm335_vm0, %v1652_v13  ;;  %1536 = vmatmul.mubr.msk.bf16.gmra.mxu1 %vm335_vm0, %v1652_v13 }
  0x41   : > { %1511 = vmatprep.mubr.msk.bf16.mxu0 %vm335_vm0, %v1653_v14  ;;  %1539 = vmatprep.mubr.msk.bf16.mxu1 %vm335_vm0, %v1653_v14 }
  0x48   : > { %1512 = vmatmul.mubr.msk.bf16.gmra.mxu0 %vm335_vm0, %v1654_v15  ;;  %1540 = vmatmul.mubr.msk.bf16.gmra.mxu1 %vm335_vm0, %v1654_v15  ;;  %v726_v15 = vld [vmem:[#allocation2 + $0x60] sm:$0xff] }
  0x49   : > { %1578 = vmatprep.mubr.msk.f32.mxu1 %vm1734_vm2, %v1733_v16  ;;  %1559 = vmatprep.mubr.msk.f32.mxu0 %vm1734_vm2, %v1733_v16 }
  0xe0   : > { %v1493_v20 = vpop.f32.mrf.mxu0  ;;  %v1521_v21 = vpop.f32.mrf.mxu1 }
  0xe2   : > { %v406_v22 = vpop.f32.mrf.mxu0  ;;  %v618_v23 = vpop.f32.mrf.mxu1 }
  0xe4   : > { %v1494_v24 = vpop.f32.mrf.mxu0  ;;  %v1522_v25 = vpop.f32.mrf.mxu1 }
  0xe6   : > { %v409_v26 = vpop.f32.mrf.mxu0  ;;  %v621_v27 = vpop.f32.mrf.mxu1 }
  0xe8   : > { %v1497_v28 = vpop.f32.mrf.mxu0  ;;  %v1525_v29 = vpop.f32.mrf.mxu1 }
  0xea   : > { %v422_v30 = vpop.f32.mrf.mxu0  ;;  %v634_v31 = vpop.f32.mrf.mxu1 }
  0xec   : > { %v1498_v32 = vpop.f32.mrf.mxu0  ;;  %v1954_v33 = vpop.f32.mrf.mxu1 }
  0xee   : > { %v1956_v34 = vpop.f32.mrf.mxu0  ;;  %v1958_v35 = vpop.f32.mrf.mxu1 }
  0xf0   : > { %v1501_v36 = vpop.f32.mrf.mxu0  ;;  %v1529_v39 = vpop.f32.mrf.mxu1 }
  0xf1   : > { %v1960_v38 = vmul.f32 %v1501_v36, %v1493_v20  ;;  %v1962_v41 = vmul.f32 %v1529_v39, %v1521_v21  ;;  %v516_v20 = vld [vmem:[#allocation2 + $0x38] sm:$0xff]  ;;  %v545_v39 = vld [vmem:[#allocation2 + $0x90] sm:$0xff] }
  0xf2   : > { %v438_v42 = vpop.f32.mrf.mxu0  ;;  %v650_v46 = vpop.f32.mrf.mxu1 }
  0xf3   : > { %v519_v44 = vadd.f32 %v511_v37, %v1960_v38  ;;  %v1965_v45 = vmul.f32 %v438_v42, %v406_v22  ;;  %v732_v48 = vadd.f32 %v724_v40, %v1962_v41  ;;  %v1968_v49 = vmul.f32 %v650_v46, %v618_v23 }
  0xf4   : > { %v1502_v50 = vpop.f32.mrf.mxu0  ;;  %v1530_v54 = vpop.f32.mrf.mxu1 }
  0xf5   : > { %528 = vst.msk [vmem:[#allocation2 + $0x10] sm:$0xff] %vm202_vm1, %v519_v44  ;;  %v517_v52 = vadd.f32 %v509_v43, %v1965_v45  ;;  %v1972_v53 = vmul.f32 %v1502_v50, %v1494_v24  ;;  %740 = vst.msk [vmem:[#allocation2 + $0x50] sm:$0xff] %vm202_vm1, %v732_v48  ;;  %v730_v56 = vadd.f32 %v722_v47, %v1968_v49  ;;  %v729_v24 = vld [vmem:[#allocation2 + $0x78] sm:$0xff]  ;;  %v543_v48 = vld [vmem:[#allocation2 + $0x80] sm:$0xff] }
  0xf6   : > { %v1976_v57 = vmul.f32 %v1530_v54, %v1522_v25  ;;  %v441_v58 = vpop.f32.mrf.mxu0  ;;  %v653_v62 = vpop.f32.mrf.mxu1 }
  0xf7   : > { %526 = vst.msk [vmem:[#allocation2] sm:$0xff] %vm202_vm1, %v517_v52  ;;  %v520_v60 = vadd.f32 %v512_v51, %v1972_v53  ;;  %v1980_v61 = vmul.f32 %v441_v58, %v409_v26  ;;  %738 = vst.msk [vmem:[#allocation2 + $0x40] sm:$0xff] %vm202_vm1, %v730_v56  ;;  %v1984_v1 = vmul.f32 %v653_v62, %v621_v27  ;;  %v755_v52 = vld [vmem:[#allocation2 + $0xc0] sm:$0xff]  ;;  %v546_v56 = vld [vmem:[#allocation2 + $0x98] sm:$0xff] }
  0xf8   : > { %v733_v0 = vadd.f32 %v725_v55, %v1976_v57  ;;  %v1505_v2 = vpop.f32.mrf.mxu0  ;;  %v1533_v6 = vpop.f32.mrf.mxu1 }
  0xf9   : > { %529 = vst.msk [vmem:[#allocation2 + $0x18] sm:$0xff] %vm202_vm1, %v520_v60  ;;  %v518_v4 = vadd.f32 %v510_v59, %v1980_v61  ;;  %v1988_v5 = vmul.f32 %v1505_v2, %v1497_v28  ;;  %v731_v8 = vadd.f32 %v723_v63, %v1984_v1  ;;  %v1992_v9 = vmul.f32 %v1533_v6, %v1525_v29  ;;  %v514_v28 = vld [vmem:[#allocation2 + $0x28] sm:$0xff]  ;;  %v758_v60 = vld [vmem:[#allocation2 + $0xd8] sm:$0xff] }
  0xfa   : > { %741 = vst.msk [vmem:[#allocation2 + $0x58] sm:$0xff] %vm202_vm1, %v733_v0  ;;  %v454_v10 = vpop.f32.mrf.mxu0  ;;  %v666_v14 = vpop.f32.mrf.mxu1  ;;  %v544_v0 = vld [vmem:[#allocation2 + $0x88] sm:$0xff] }
  0xfb   : > { %527 = vst.msk [vmem:[#allocation2 + $0x8] sm:$0xff] %vm202_vm1, %v518_v4  ;;  %v523_v12 = vadd.f32 %v515_v3, %v1988_v5  ;;  %v1996_v13 = vmul.f32 %v454_v10, %v422_v30  ;;  %739 = vst.msk [vmem:[#allocation2 + $0x48] sm:$0xff] %vm202_vm1, %v731_v8  ;;  %v736_v17 = vadd.f32 %v728_v7, %v1992_v9  ;;  %v756_v4 = vld [vmem:[#allocation2 + $0xc8] sm:$0xff]  ;;  %v549_v8 = vld [vmem:[#allocation2 + $0xb0] sm:$0xff] }
  0xfc   : > { %v2000_v18 = vmul.f32 %v666_v14, %v634_v31  ;;  %v1506_v19 = vpop.f32.mrf.mxu0  ;;  %v1534_v23 = vpop.f32.mrf.mxu1 }
  0xfd   : > { %532 = vst.msk [vmem:[#allocation2 + $0x30] sm:$0xff] %vm202_vm1, %v523_v12  ;;  %v521_v21 = vadd.f32 %v513_v11, %v1996_v13  ;;  %v2004_v22 = vmul.f32 %v1506_v19, %v1498_v32  ;;  %744 = vst.msk [vmem:[#allocation2 + $0x70] sm:$0xff] %vm202_vm1, %v736_v17  ;;  %v2009_v26 = vmul.f32 %v1534_v23, %v1954_v33  ;;  %v727_v32 = vld [vmem:[#allocation2 + $0x68] sm:$0xff]  ;;  %v761_v12 = vld [vmem:[#allocation2 + $0xf0] sm:$0xff] }
  0xfe   : > { %v734_v25 = vadd.f32 %v726_v15, %v2000_v18  ;;  %v457_v27 = vpop.f32.mrf.mxu0  ;;  %v669_v31 = vpop.f32.mrf.mxu1  ;;  %v547_v17 = vld [vmem:[#allocation2 + $0xa0] sm:$0xff] }
  0xff   : > { %530 = vst.msk [vmem:[#allocation2 + $0x20] sm:$0xff] %vm202_vm1, %v521_v21  ;;  %v524_v29 = vadd.f32 %v516_v20, %v2004_v22  ;;  %v2014_v30 = vmul.f32 %v457_v27, %v1956_v34  ;;  %v737_v36 = vadd.f32 %v729_v24, %v2009_v26  ;;  %v2019_v37 = vmul.f32 %v669_v31, %v1958_v35  ;;  %v757_v34 = vld [vmem:[#allocation2 + $0xd0] sm:$0xff]  ;;  %v759_v21 = vld [vmem:[#allocation2 + $0xe0] sm:$0xff]  ;;  %v762_v31 = vld [vmem:[#allocation2 + $0xf8] sm:$0xff] }
 0x100   : > { %742 = vst.msk [vmem:[#allocation2 + $0x60] sm:$0xff] %vm202_vm1, %v734_v25  ;;  %v1509_v33 = vpop.f32.mrf.mxu0  ;;  %v1537_v43 = vpop.f32.mrf.mxu1  ;;  %v550_v25 = vld [vmem:[#allocation2 + $0xb8] sm:$0xff] }
 0x101   : > { %533 = vst.msk [vmem:[#allocation2 + $0x38] sm:$0xff] %vm202_vm1, %v524_v29  ;;  %v522_v40 = vadd.f32 %v514_v28, %v2014_v30  ;;  %v536_v42 = vmul.f32 %v1509_v33, %v1960_v38  ;;  %745 = vst.msk [vmem:[#allocation2 + $0x78] sm:$0xff] %vm202_vm1, %v737_v36  ;;  %v735_v44 = vadd.f32 %v727_v32, %v2019_v37 }
 0x102   : > { %v748_v46 = vmul.f32 %v1537_v43, %v1962_v41  ;;  %v470_v47 = vpop.f32.mrf.mxu0  ;;  %v682_v51 = vpop.f32.mrf.mxu1 }
 0x103   : > { %531 = vst.msk [vmem:[#allocation2 + $0x28] sm:$0xff] %vm202_vm1, %v522_v40  ;;  %v553_v35 = vadd.f32 %v545_v39, %v536_v42  ;;  %v534_v50 = vmul.f32 %v1965_v45, %v470_v47  ;;  %743 = vst.msk [vmem:[#allocation2 + $0x68] sm:$0xff] %vm202_vm1, %v735_v44  ;;  %v746_v54 = vmul.f32 %v1968_v49, %v682_v51  ;;  %v548_v40 = vld [vmem:[#allocation2 + $0xa8] sm:$0xff] }
 0x104   : > { %v765_v38 = vadd.f32 %v757_v34, %v748_v46  ;;  %v1510_v55 = vpop.f32.mrf.mxu0  ;;  %v1538_v59 = vpop.f32.mrf.mxu1  ;;  %v760_v34 = vld [vmem:[#allocation2 + $0xe8] sm:$0xff] }
 0x105   : > { %561 = vst.msk [vmem:[#allocation2 + $0x90] sm:$0xff] %vm202_vm1, %v553_v35  ;;  %v551_v58 = vadd.f32 %v543_v48, %v534_v50  ;;  %v537_v41 = vmul.f32 %v1510_v55, %v1972_v53  ;;  %v763_v62 = vadd.f32 %v755_v52, %v746_v54  ;;  %v749_v45 = vmul.f32 %v1538_v59, %v1976_v57 }
 0x106   : > { %773 = vst.msk [vmem:[#allocation2 + $0xd0] sm:$0xff] %vm202_vm1, %v765_v38  ;;  %v473_v63 = vpop.f32.mrf.mxu0  ;;  %v685_v3 = vpop.f32.mrf.mxu1 }
 0x107   : > { %559 = vst.msk [vmem:[#allocation2 + $0x80] sm:$0xff] %vm202_vm1, %v551_v58  ;;  %v554_v2 = vadd.f32 %v546_v56, %v537_v41  ;;  %v535_v49 = vmul.f32 %v1980_v61, %v473_v63  ;;  %771 = vst.msk [vmem:[#allocation2 + $0xc0] sm:$0xff] %vm202_vm1, %v763_v62  ;;  %v766_v6 = vadd.f32 %v758_v60, %v749_v45  ;;  %v1431_v58 = vld [vmem:[%s2265_s2 + $0x60] sm:$0xff] }
 0x108   : > { %v747_v53 = vmul.f32 %v1984_v1, %v685_v3  ;;  %v1513_v7 = vpop.f32.mrf.mxu0  ;;  %v1541_v11 = vpop.f32.mrf.mxu1  ;;  %1569 = vmatpush3.msra.mxu1 %v1431_v58  ;;  %v870_v58 = vlaneseq }
 0x109   : > { %562 = vst.msk [vmem:[#allocation2 + $0x98] sm:$0xff] %vm202_vm1, %v554_v2  ;;  %v552_v10 = vadd.f32 %v544_v0, %v535_v49  ;;  %v540_v57 = vmul.f32 %v1513_v7, %v1988_v5  ;;  %774 = vst.msk [vmem:[#allocation2 + $0xd8] sm:$0xff] %vm202_vm1, %v766_v6  ;;  %v752_v61 = vmul.f32 %v1541_v11, %v1992_v9  ;;  %1570 = vmatprep.subr.mxu1 %v1733_v16  ;;  %v1430_v49 = vld [vmem:[%s2265_s2 + $0x58] sm:$0xff] }
 0x10a   : > { %v764_v14 = vadd.f32 %v756_v4, %v747_v53  ;;  %v486_v15 = vpop.f32.mrf.mxu0  ;;  %v698_v20 = vpop.f32.mrf.mxu1  ;;  %1571 = vmatpush3.msra.mxu1 %v1430_v49 }
 0x10b   : > { %560 = vst.msk [vmem:[#allocation2 + $0x88] sm:$0xff] %vm202_vm1, %v552_v10  ;;  %v557_v19 = vadd.f32 %v549_v8, %v540_v57  ;;  %v538_v1 = vmul.f32 %v1996_v13, %v486_v15  ;;  %v769_v23 = vadd.f32 %v761_v12, %v752_v61  ;;  %v750_v5 = vmul.f32 %v2000_v18, %v698_v20  ;;  %v1429_v57 = vld [vmem:[%s2265_s2 + $0x50] sm:$0xff]  ;;  %v783_v61 = vld [vmem:[#allocation2 + $0x8] sm:$0xff] }
 0x10c   : > { %772 = vst.msk [vmem:[#allocation2 + $0xc8] sm:$0xff] %vm202_vm1, %v764_v14  ;;  %v1514_v24 = vpop.f32.mrf.mxu0  ;;  %v1040_v27 = vld [vmem:[#allocation2 + $0x90] sm:$0xff]  ;;  %v1542_v29 = vpop.f32.mrf.mxu1  ;;  %1572 = vmatprep.subr.mxu1 %v1733_v16  ;;  %v782_v14 = vld [vmem:[#allocation2] sm:$0xff]  ;;  %v1428_v20 = vld [vmem:[%s2265_s2 + $0x48] sm:$0xff] }
 0x10d   : > { %565 = vst.msk [vmem:[#allocation2 + $0xb0] sm:$0xff] %vm202_vm1, %v557_v19  ;;  %v555_v9 = vadd.f32 %v547_v17, %v538_v1  ;;  %v541_v28 = vmul.f32 %v1514_v24, %v2004_v22  ;;  %v1048_v32 = vld [vmem:[#allocation2 + $0xd0] sm:$0xff]  ;;  %v1060_v13 = vsel %vm202_vm1, %v1040_v27, 0.0  ;;  %777 = vst.msk [vmem:[#allocation2 + $0xf0] sm:$0xff] %vm202_vm1, %v769_v23  ;;  %v767_v36 = vadd.f32 %v759_v21, %v750_v5  ;;  %v790_v19 = vld [vmem:[#allocation2 + $0x40] sm:$0xff] }
 0x10e   : > { %v753_v33 = vmul.f32 %v1542_v29, %v2009_v26  ;;  %v1084_v18 = vsel %vm202_vm1, %v1048_v32, 0.0  ;;  %1061 = vadd.xlane.f32.xlu0 %v1060_v13  ;;  %v489_v39 = vpop.f32.mrf.mxu0  ;;  %v1038_v42 = vld [vmem:[#allocation2 + $0x80] sm:$0xff]  ;;  %v701_v22 = vpop.f32.mrf.mxu1  ;;  %1573 = vmatpush3.msra.mxu1 %v1429_v57  ;;  %v798_v15 = vsel %vm202_vm1, %v782_v14, 0.0  ;;  %v801_v17 = vsel %vm202_vm1, %v783_v61, 0.0  ;;  %v791_v1 = vld [vmem:[#allocation2 + $0x48] sm:$0xff]  ;;  %v784_v5 = vld [vmem:[#allocation2 + $0x10] sm:$0xff] }
 0x10f   : > { %563 = vst.msk [vmem:[#allocation2 + $0xa0] sm:$0xff] %vm202_vm1, %v555_v9  ;;  %v558_v43 = vadd.f32 %v550_v25, %v541_v28  ;;  %1085 = vadd.xlane.f32.xlu1 %v1084_v18  ;;  %v539_v44 = vmul.f32 %v2014_v30, %v489_v39  ;;  %v1046_v46 = vld [vmem:[#allocation2 + $0xc0] sm:$0xff]  ;;  %775 = vst.msk [vmem:[#allocation2 + $0xe0] sm:$0xff] %vm202_vm1, %v767_v36  ;;  %v751_v26 = vmul.f32 %v2019_v37, %v701_v22  ;;  %v792_v24 = vld [vmem:[#allocation2 + $0x50] sm:$0xff] }
 0x110   : > { %v770_v47 = vadd.f32 %v762_v31, %v753_v33  ;;  %v1054_v35 = vsel %vm202_vm1, %v1038_v42, 0.0  ;;  %v1078_v51 = vsel %vm202_vm1, %v1046_v46, 0.0  ;;  %v1041_v52 = vld [vmem:[#allocation2 + $0x98] sm:$0xff]  ;;  %1574 = vmatprep.subr.mxu1 %v1733_v16  ;;  %v822_v21 = vsel %vm202_vm1, %v790_v19, 0.0  ;;  %v1427_v25 = vld [vmem:[%s2265_s2 + $0x40] sm:$0xff]  ;;  %v787_v39 = vld [vmem:[#allocation2 + $0x28] sm:$0xff] }
 0x111   : > { %566 = vst.msk [vmem:[#allocation2 + $0xb8] sm:$0xff] %vm202_vm1, %v558_v43  ;;  %v556_v48 = vadd.f32 %v548_v40, %v539_v44  ;;  %v768_v50 = vadd.f32 %v760_v34, %v751_v26  ;;  %v1049_v30 = vld [vmem:[#allocation2 + $0xd8] sm:$0xff]  ;;  %v1063_v37 = vsel %vm202_vm1, %v1041_v52, 0.0  ;;  %1575 = vmatpush3.msra.mxu1 %v1428_v20  ;;  %v825_v23 = vsel %vm202_vm1, %v791_v1, 0.0  ;;  %v786_v13 = vld [vmem:[#allocation2 + $0x20] sm:$0xff]  ;;  %v795_v40 = vld [vmem:[#allocation2 + $0x68] sm:$0xff] }
 0x112   : > { %778 = vst.msk [vmem:[#allocation2 + $0xf8] sm:$0xff] %vm202_vm1, %v770_v47  ;;  %1055 = vadd.xlane.f32.xlu0 %v1054_v35  ;;  %v1087_v38 = vsel %vm202_vm1, %v1049_v30, 0.0  ;;  %v1039_v54 = vld [vmem:[#allocation2 + $0x88] sm:$0xff]  ;;  %1576 = vmatprep.subr.mxu1 %v1733_v16  ;;  %v804_v27 = vsel %vm202_vm1, %v784_v5, 0.0  ;;  %v828_v9 = vsel %vm202_vm1, %v792_v24, 0.0  ;;  %v785_v28 = vld [vmem:[#allocation2 + $0x18] sm:$0xff] }
 0x113   : > { %564 = vst.msk [vmem:[#allocation2 + $0xa8] sm:$0xff] %vm202_vm1, %v556_v48  ;;  %1079 = vadd.xlane.f32.xlu1 %v1078_v51  ;;  %776 = vst.msk [vmem:[#allocation2 + $0xe8] sm:$0xff] %vm202_vm1, %v768_v50  ;;  %v1047_v55 = vld [vmem:[#allocation2 + $0xc8] sm:$0xff]  ;;  %v1057_v56 = vsel %vm202_vm1, %v1039_v54, 0.0  ;;  %1577 = vmatpush3.msra.mxu1 %v1427_v25  ;;  %v793_v29 = vld [vmem:[#allocation2 + $0x58] sm:$0xff]  ;;  %v807_v31 = vsel %vm202_vm1, %v785_v28, 0.0 }
 0x114   : > { %v1081_v41 = vsel %vm202_vm1, %v1047_v55, 0.0  ;;  %v1044_v59 = vld [vmem:[#allocation2 + $0xb0] sm:$0xff]  ;;  %v831_v32 = vsel %vm202_vm1, %v793_v29, 0.0  ;;  %v794_v36 = vld [vmem:[#allocation2 + $0x60] sm:$0xff]  ;;  %v810_v33 = vsel %vm202_vm1, %v786_v13, 0.0  ;;  %v813_v42 = vsel %vm202_vm1, %v787_v39, 0.0 }
 0x115   : > { %v1052_v60 = vld [vmem:[#allocation2 + $0xf0] sm:$0xff]  ;;  %v1072_v62 = vsel %vm202_vm1, %v1044_v59, 0.0  ;;  %v834_v18 = vsel %vm202_vm1, %v794_v36, 0.0  ;;  %v837_v43 = vsel %vm202_vm1, %v795_v40, 0.0  ;;  %v789_v47 = vld [vmem:[#allocation2 + $0x38] sm:$0xff]  ;;  %v851_v52 = vld [vmem:[%s2265_s2 + $0x28] sm:$0xff] }
 0x116   : > { %1064 = vadd.xlane.f32.xlu0 %v1063_v37  ;;  %v1096_v45 = vsel %vm202_vm1, %v1052_v60, 0.0  ;;  %v1042_v63 = vld [vmem:[#allocation2 + $0xa0] sm:$0xff]  ;;  %v788_v22 = vld [vmem:[#allocation2 + $0x30] sm:$0xff]  ;;  %v797_v26 = vld [vmem:[#allocation2 + $0x78] sm:$0xff]  ;;  %v819_v48 = vsel %vm202_vm1, %v789_v47, 0.0  ;;  %v871_v60 = vand.u32 127, %v870_v58 }
 0x117   : > { %1088 = vadd.xlane.f32.xlu1 %v1087_v38  ;;  %v1050_v0 = vld [vmem:[#allocation2 + $0xe0] sm:$0xff]  ;;  %v1066_v2 = vsel %vm202_vm1, %v1042_v63, 0.0  ;;  %v796_v34 = vld [vmem:[#allocation2 + $0x70] sm:$0xff]  ;;  %v816_v44 = vsel %vm202_vm1, %v788_v22, 0.0  ;;  %v853_v35 = vld [vmem:[%s2265_s2 + $0x38] sm:$0xff]  ;;  %v843_v50 = vsel %vm202_vm1, %v797_v26, 0.0 }
 0x118   : > { %v1090_v3 = vsel %vm202_vm1, %v1050_v0, 0.0  ;;  %v1045_v8 = vld [vmem:[#allocation2 + $0xb8] sm:$0xff]  ;;  %v840_v46 = vsel %vm202_vm1, %v796_v34, 0.0  ;;  %1544 = vmatpush3.msra.mxu0 %v853_v35  ;;  %v852_v51 = vld [vmem:[%s2265_s2 + $0x30] sm:$0xff]  ;;  %v850_v30 = vld [vmem:[%s2265_s2 + $0x20] sm:$0xff]  ;;  %v873_v0 = vshrl.u32 %v870_v58, 7 }
 0x119   : > { %v1053_v10 = vld [vmem:[#allocation2 + $0xf8] sm:$0xff]  ;;  %v1075_v11 = vsel %vm202_vm1, %v1045_v8, 0.0  ;;  %1545 = vmatprep.subr.mxu0 %v1733_v16  ;;  %v848_v38 = vld [vmem:[%s2265_s2 + $0x10] sm:$0xff]  ;;  %v847_v54 = vld [vmem:[%s2265_s2 + $0x8] sm:$0xff]  ;;  %v904_v61 = vadd.s32 4294967256, %v871_v60 }
 0x11a   : > { %1058 = vadd.xlane.f32.xlu0 %v1057_v56  ;;  %v1043_v4 = vld [vmem:[#allocation2 + $0xa8] sm:$0xff]  ;;  %v1099_v12 = vsel %vm202_vm1, %v1053_v10, 0.0  ;;  %1546 = vmatpush3.msra.mxu0 %v852_v51  ;;  %v849_v37 = vld [vmem:[%s2265_s2 + $0x18] sm:$0xff]  ;;  %v846_v55 = vld [vmem:[%s2265_s2] sm:$0xff] }
 0x11b   : > { %1082 = vadd.xlane.f32.xlu1 %v1081_v41  ;;  %v1051_v6 = vld [vmem:[#allocation2 + $0xe8] sm:$0xff]  ;;  %v1069_v53 = vsel %vm202_vm1, %v1043_v4, 0.0  ;;  %1547 = vmatprep.subr.mxu0 %v1733_v16 }
 0x11c   : > { %v1093_v7 = vsel %vm202_vm1, %v1051_v6, 0.0  ;;  %1548 = vmatpush3.msra.mxu0 %v851_v52 }
 0x11d   : > { %1549 = vmatprep.subr.mxu0 %v1733_v16 }
 0x11e   : > { %1073 = vadd.xlane.f32.xlu0 %v1072_v62  ;;  %1550 = vmatpush3.msra.mxu0 %v850_v30 }
 0x11f   : > { %1097 = vadd.xlane.f32.xlu1 %v1096_v45  ;;  %1551 = vmatprep.subr.mxu0 %v1733_v16  ;;  %v876_v45 = vadd.s32 4294967288, %v871_v60 }
 0x120   : > { %1552 = vmatpush3.msra.mxu0 %v849_v37 }
 0x121   : > { %1553 = vmatprep.subr.mxu0 %v1733_v16  ;;  %v2143_v49 = vsub.s32 %v876_v45, %v873_v0 }
 0x122   : > { %1067 = vadd.xlane.f32.xlu0 %v1066_v2  ;;  %1554 = vmatpush3.msra.mxu0 %v848_v38 }
 0x123   : > { %1091 = vadd.xlane.f32.xlu1 %v1090_v3  ;;  %1555 = vmatprep.subr.mxu0 %v1733_v16  ;;  %v883_v3 = vadd.s32 4294967280, %v871_v60 }
 0x124   : > { %1556 = vmatpush3.msra.mxu0 %v847_v54 }
 0x125   : > { %1557 = vmatprep.subr.mxu0 %v1733_v16  ;;  %v2145_v16 = vsub.s32 %v871_v60, %v873_v0  ;;  %v2148_v10 = vsub.s32 %v883_v3, %v873_v0 }
 0x126   : > { %1070 = vadd.xlane.f32.xlu0 %v1069_v53  ;;  %1558 = vmatpush3.msra.mxu0 %v846_v55  ;;  %v897_v53 = vadd.s32 4294967264, %v871_v60 }
 0x127   : > { %1094 = vadd.xlane.f32.xlu1 %v1093_v7  ;;  %v890_v7 = vadd.s32 4294967272, %v871_v60 }
 0x129   : > { %v2155_v19 = vsub.s32 %v890_v7, %v873_v0 }
 0x12a   : > { %1076 = vadd.xlane.f32.xlu0 %v1075_v11 }
 0x12b   : > { %1100 = vadd.xlane.f32.xlu1 %v1099_v12 }
 0x12e   : > { %799 = vadd.xlane.f32.xlu0 %v798_v15 }
 0x12f   : > { %802 = vadd.xlane.f32.xlu1 %v801_v17  ;;  %v2153_v17 = vsub.s32 %v897_v53, %v873_v0 }
 0x132   : > { %823 = vadd.xlane.f32.xlu0 %v822_v21 }
 0x133   : > { %826 = vadd.xlane.f32.xlu1 %v825_v23  ;;  %v911_v23 = vadd.s32 4294967248, %v871_v60 }
 0x136   : > { %805 = vadd.xlane.f32.xlu0 %v804_v27  ;;  %v2161_v27 = vsub.s32 %v904_v61, %v873_v0 }
 0x137   : > { %829 = vadd.xlane.f32.xlu1 %v828_v9  ;;  %v918_v9 = vadd.s32 4294967240, %v871_v60 }
 0x13a   : > { %808 = vadd.xlane.f32.xlu0 %v807_v31 }
 0x13b   : > { %832 = vadd.xlane.f32.xlu1 %v831_v32 }
 0x13e   : > { %811 = vadd.xlane.f32.xlu0 %v810_v33  ;;  %v2169_v33 = vsub.s32 %v911_v23, %v873_v0 }
 0x13f   : > { %835 = vadd.xlane.f32.xlu1 %v834_v18 }
 0x142   : > { %814 = vadd.xlane.f32.xlu0 %v813_v42 }
 0x143   : > { %838 = vadd.xlane.f32.xlu1 %v837_v43  ;;  %v2173_v43 = vsub.s32 %v918_v9, %v873_v0 }
 0x146   : > { %817 = vadd.xlane.f32.xlu0 %v816_v44 }
 0x147   : > { %841 = vadd.xlane.f32.xlu1 %v840_v46 }
 0x14a   : > { %820 = vadd.xlane.f32.xlu0 %v819_v48 }
 0x14b   : > { %844 = vadd.xlane.f32.xlu1 %v843_v50 }
 0x197   : > { %v1062_v56 = vpop.xlane.xlu0 %1061 }
 0x198   : > { %v1086_v41 = vpop.xlane.xlu1 %1085  ;;  %v1139_v20 = vrot.slane %v1062_v56, %v2148_v10 }
 0x199   : > { %v1178_v24 = vrot.slane %v1086_v41, %v2148_v10 }
 0x19b   : > { %v1056_v59 = vpop.xlane.xlu0 %1055 }
 0x19c   : > { %v1080_v62 = vpop.xlane.xlu1 %1079  ;;  %v1130_v12 = vrot.slane %v1056_v59, %v2145_v16 }
 0x19d   : > { %v1169_v15 = vrot.slane %v1080_v62, %v2145_v16 }
 0x19f   : > { %v1065_v63 = vpop.xlane.xlu0 %1064 }
 0x1a0   : > { %v1089_v2 = vpop.xlane.xlu1 %1088  ;;  %v1144_v31 = vrot.slane %v1065_v63, %v2155_v19 }
 0x1a1   : > { %v1183_v36 = vrot.slane %v1089_v2, %v2155_v19 }
 0x1a3   : > { %v1059_v4 = vpop.xlane.xlu0 %1058 }
 0x1a4   : > { %v1083_v6 = vpop.xlane.xlu1 %1082  ;;  %v1134_v8 = vrot.slane %v1059_v4, %v2143_v49 }
 0x1a5   : > { %v1173_v57 = vrot.slane %v1083_v6, %v2143_v49 }
 0x1a6   : > { %v1135_v1 = vsel %vm881_vm3, %v1134_v8, %v1130_v12 }
 0x1a7   : > { %v1074_v11 = vpop.xlane.xlu0 %1073  ;;  %v1174_v21 = vsel %vm881_vm3, %v1173_v57, %v1169_v15  ;;  %v1140_v28 = vsel %vm888_vm4, %v1139_v20, %v1135_v1 }
 0x1a8   : > { %v1098_v14 = vpop.xlane.xlu1 %1097  ;;  %v1179_v32 = vsel %vm888_vm4, %v1178_v24, %v1174_v21  ;;  %v1145_v39 = vsel %vm895_vm5, %v1144_v31, %v1140_v28  ;;  %v1159_v26 = vrot.slane %v1074_v11, %v2169_v33 }
 0x1a9   : > { %v1184_v22 = vsel %vm895_vm5, %v1183_v36, %v1179_v32  ;;  %v1198_v50 = vrot.slane %v1098_v14, %v2169_v33 }
 0x1ab   : > { %v1068_v5 = vpop.xlane.xlu0 %1067 }
 0x1ac   : > { %v1092_v25 = vpop.xlane.xlu1 %1091  ;;  %v1149_v29 = vrot.slane %v1068_v5, %v2153_v17 }
 0x1ad   : > { %v1188_v13 = vrot.slane %v1092_v25, %v2153_v17 }
 0x1ae   : > { %v1150_v34 = vsel %vm902_vm6, %v1149_v29, %v1145_v39 }
 0x1af   : > { %v1071_v18 = vpop.xlane.xlu0 %1070  ;;  %v1189_v46 = vsel %vm902_vm6, %v1188_v13, %v1184_v22 }
 0x1b0   : > { %v1095_v40 = vpop.xlane.xlu1 %1094  ;;  %v1154_v42 = vrot.slane %v1071_v18, %v2161_v27 }
 0x1b1   : > { %v1193_v44 = vrot.slane %v1095_v40, %v2161_v27 }
 0x1b2   : > { %v1155_v47 = vsel %vm909_vm7, %v1154_v42, %v1150_v34 }
 0x1b3   : > { %v1194_v48 = vsel %vm909_vm7, %v1193_v44, %v1189_v46  ;;  %v1077_v35 = vpop.xlane.xlu0 %1076  ;;  %v1160_v37 = vsel %vm916_vm8, %v1159_v26, %v1155_v47 }
 0x1b4   : > { %v1101_v51 = vpop.xlane.xlu1 %1100  ;;  %v1164_v52 = vrot.slane %v1077_v35, %v2173_v43  ;;  %v1199_v38 = vsel %vm916_vm8, %v1198_v50, %v1194_v48 }
 0x1b5   : > { %v1203_v30 = vrot.slane %v1101_v51, %v2173_v43 }
 0x1b6   : > { %v1165_v54 = vsel %vm923_vm9, %v1164_v52, %v1160_v37 }
 0x1b7   : > { %v1204_v55 = vsel %vm923_vm9, %v1203_v30, %v1199_v38  ;;  %v800_v56 = vpop.xlane.xlu0 %799 }
 0x1b8   : > { %v1205_v58 = vsel %vm964_vm10, %v1204_v55, %v1165_v54  ;;  %v803_v41 = vpop.xlane.xlu1 %802  ;;  %v875_v53 = vrot.slane %v800_v56, %v2145_v16 }
 0x1b9   : > { %1579 = vmatmul.mubr.msk.f32.vlgmr.msra.gmra.mxu1 %vm202_vm1, %v1205_v58  ;;  %v880_v6 = vrot.slane %v803_v41, %v2143_v49 }
 0x1bb   : > { %v824_v59 = vpop.xlane.xlu0 %823  ;;  %v882_v20 = vsel %vm881_vm3, %v880_v6, %v875_v53 }
 0x1bc   : > { %v827_v60 = vpop.xlane.xlu1 %826  ;;  %v928_v57 = vrot.slane %v824_v59, %v2145_v16 }
 0x1bd   : > { %v932_v8 = vrot.slane %v827_v60, %v2143_v49 }
 0x1bf   : > { %v806_v62 = vpop.xlane.xlu0 %805  ;;  %v933_v16 = vsel %vm881_vm3, %v932_v8, %v928_v57 }
 0x1c0   : > { %v830_v45 = vpop.xlane.xlu1 %829  ;;  %v887_v11 = vrot.slane %v806_v62, %v2148_v10 }
 0x1c1   : > { %v937_v12 = vrot.slane %v830_v45, %v2148_v10 }
 0x1c2   : > { %v889_v5 = vsel %vm888_vm4, %v887_v11, %v882_v20 }
 0x1c3   : > { %v809_v63 = vpop.xlane.xlu0 %808 }
 0x1c4   : > { %v833_v0 = vpop.xlane.xlu1 %832  ;;  %v894_v14 = vrot.slane %v809_v63, %v2155_v19 }
 0x1c5   : > { %v942_v61 = vrot.slane %v833_v0, %v2155_v19  ;;  %v938_v19 = vsel %vm888_vm4, %v937_v12, %v933_v16 }
 0x1c6   : > { %v896_v25 = vsel %vm895_vm5, %v894_v14, %v889_v5 }
 0x1c7   : > { %v812_v2 = vpop.xlane.xlu0 %811  ;;  %v943_v28 = vsel %vm895_vm5, %v942_v61, %v938_v19 }
 0x1c8   : > { %v836_v3 = vpop.xlane.xlu1 %835  ;;  %v901_v15 = vrot.slane %v812_v2, %v2153_v17 }
 0x1c9   : > { %v947_v21 = vrot.slane %v836_v3, %v2153_v17 }
 0x1ca   : > { %v903_v17 = vsel %vm902_vm6, %v901_v15, %v896_v25 }
 0x1cb   : > { %v815_v4 = vpop.xlane.xlu0 %814  ;;  %v948_v31 = vsel %vm902_vm6, %v947_v21, %v943_v28 }
 0x1cc   : > { %v839_v7 = vpop.xlane.xlu1 %838  ;;  %v908_v23 = vrot.slane %v815_v4, %v2161_v27 }
 0x1cd   : > { %v952_v10 = vrot.slane %v839_v7, %v2161_v27 }
 0x1ce   : > { %v910_v32 = vsel %vm909_vm7, %v908_v23, %v903_v17 }
 0x1cf   : > { %v818_v1 = vpop.xlane.xlu0 %817  ;;  %v953_v36 = vsel %vm909_vm7, %v952_v10, %v948_v31 }
 0x1d0   : > { %v842_v49 = vpop.xlane.xlu1 %841  ;;  %v915_v24 = vrot.slane %v818_v1, %v2169_v33 }
 0x1d1   : > { %v957_v9 = vrot.slane %v842_v49, %v2169_v33 }
 0x1d2   : > { %v917_v18 = vsel %vm916_vm8, %v915_v24, %v910_v32 }
 0x1d3   : > { %v821_v29 = vpop.xlane.xlu0 %820  ;;  %v958_v39 = vsel %vm916_vm8, %v957_v9, %v953_v36 }
 0x1d4   : > { %v845_v13 = vpop.xlane.xlu1 %844  ;;  %v922_v27 = vrot.slane %v821_v29, %v2173_v43 }
 0x1d5   : > { %v962_v33 = vrot.slane %v845_v13, %v2173_v43 }
 0x1d6   : > { %v924_v40 = vsel %vm923_vm9, %v922_v27, %v917_v18 }
 0x1d7   : > { %v963_v42 = vsel %vm923_vm9, %v962_v33, %v958_v39 }
 0x1d8   : > { %v965_v22 = vsel %vm964_vm10, %v963_v42, %v924_v40 }
 0x1d9   : > { %1560 = vmatmul.mubr.msk.f32.vlgmr.msra.gmra.mxu0 %vm202_vm1, %v965_v22 }
 0x279   : > { %v1274_v34 = vpop.f32.mrf.mxu1 }
 0x27a   : > { %1279 = vrot.lane.b32.xlu0 %v1274_v34, %s1735_s9 }
 0x27b   : > { %v1580_v44 = vpop.f32.mrf.mxu1 }
 0x299   : > { %v1034_v46 = vpop.f32.mrf.mxu0 }
 0x29b   : > { %v1561_v47 = vpop.f32.mrf.mxu0 }
 0x2ec   : > { %v1280_v43 = vpop.permute.xlu0 %1279 }
 0x2ed   : > { %v1282_v26 = vsel %vm335_vm0, %v1034_v46, %v1280_v43 }
 0x2ee   : > { %v1283_v48 = vmul.f32 0.015625, %v1282_v26 }
 0x2f0   : > { %1285 = vst.msk [vmem:[%s186_s19] sm:$0x3] %vm1284_vm11, %v1283_v48 }
 0x2f1   : > { %1668 = shalt.err (!%p1665_p5)
}
 0x2f2   : > { %s1669_s5 = scalar_lea.hbm %s1298_s27, 32  ;;  %s1673_s8 = scalar_lea.hbm %s2266_s3, 64 }
 0x2f3   : > { %p1670_p6 = scmp.ne.s32.totalorder %s1298_s27, %s1669_s5  ;;  %p1674_p10 = scmp.lt.s32.totalorder %s1298_s27, %s2266_s3 }
 0x2f4   : > { %p1675_p11 = scmp.lt.s32.totalorder %s1673_s8, %s1669_s5 }
 0x2f5   : > { %p1671_p7 = pnand %p1670_p6, %p1797_p4 }
 0x2f6   : > { %p1676_p12 = por %p1675_p11, %p1674_p10 }
 0x2f7   : > { %p1672_p9 = pneg %p1671_p7 }
 0x2f9   : > { %p1677_p13 = pnand %p1676_p12, %p1672_p9 }
 0x2fb   : > { %1680 = shalt.err (!%p1677_p13)
}
 0x2fc   : > { %1581 = dma.vmem_to_hbm [thread:$0]  (%p1797_p4), %s1301_s21, 32, %s1298_s27, %s1287_s28  }
 0x2fd PF: > { %p1587_p0 = scmp.ge.s32.totalorder %s1731_s17, 2  ;;  %s1312_s11 = sand.u32 1, %s1711_s12  }
 0x2fe   : > { %s1313_s18 = scalar_lea.sflag [#allocation4], %s1312_s11 }
 0x2ff   : > { %p1584_p1 = pnand %p1587_p0, %p1804_p8 }
 0x301   : > { %p1585_p2 = pneg %p1584_p1 }
 0x303   : > { %1706 = dma.done.wait (%p1585_p2), %s1313_s18, 32  }
 0x304   : > { %1708 = vsyncadd (%p1585_p2), %s1313_s18, 4294967264  ;;  %s16_s17 = sadd.s32 1, %s1731_s17   ;;  %s2269_s12 = smov %s1715_s13 }
 0x305   : > { %p13_p3 = scmp.ge.s32.totalorder %s16_s17, 4   ;;  %s2270_s13 = smov %s1719_s14 }
 0x306   : > { %s2271_s14 = smov %s1810_s25  ;;  %s2272_s15 = smov %s1727_s16 }
 0x307   : > { %s2273_s16 = smov %s2275_s20  ;;  %15 = sbr.rel (!%p13_p3) target bundleno = 4 (0x4), region = 80 }
 0x30c   :  { %1318 = vsyncpa [#allocation4], 1 }
 0x30d   :  { %1320 = vsyncpa [#allocation4 + $0x1], 1 }

</bundles_post_ra>
